<compile_context>
chip_gen: v7x
topology: tpu7x:2x2x1
jax: 0.10.0
libtpu: 0.0.40
codegen_flags: <defaults>
</compile_context>

<pallas_src>
import functools

import jax
import jax.numpy as jnp
from jax.experimental import pallas as pl
from jax.experimental.pallas import tpu as pltpu


def _pmlabla1_kernel(a_ref, p_ref, n_ref, n2_ref, p2_ref, w_ref,
                     oa_ref, op_ref, on_ref, on2_ref, op2_ref,
                     *, mxu_dtype):
    # w_ref: [L, F] (torch nn.Linear layout, bias=False). Contract the last
    # dims of both operands (x @ w.T) so no transpose is ever materialized.
    w = w_ref[...].astype(mxu_dtype)

    def lin(x_ref, o_ref):
        x = x_ref[...].astype(mxu_dtype)
        y = jax.lax.dot_general(
            x, w,
            dimension_numbers=(((1,), (1,)), ((), ())),
            preferred_element_type=jnp.float32)
        o_ref[...] = y.astype(o_ref.dtype)

    lin(a_ref, oa_ref)
    lin(p_ref, op_ref)
    lin(n_ref, on_ref)
    lin(n2_ref, on2_ref)
    lin(p2_ref, op2_ref)


def pmlabla1net_forward(anchor, positive, negative, negative2, positive2,
                        w_linear, *, mxu_dtype=jnp.bfloat16):
    """Shared Linear(n_feature -> n_linear, bias=False) applied to 5 inputs.

    w_linear: [n_linear, n_feature] (PyTorch layout), passed untransposed.
    Returns a tuple of 5 arrays of shape [B, n_linear] in the input dtype.
    """
    B, F = anchor.shape
    L, F_w = w_linear.shape
    assert F == F_w, (F, F_w)
    out_dtype = anchor.dtype
    if mxu_dtype is None:
        mxu_dtype = out_dtype

    # ---- VMEM-budgeted row tile, gated on problem size --------------------
    # Per grid step (auto double-buffered): 5 input tiles [tm, F], 5 output
    # tiles [tm, L], plus the resident (but still double-buffered) weight.
    itemsize = jnp.dtype(out_dtype).itemsize
    w_itemsize = jnp.dtype(w_linear.dtype).itemsize
    vmem_budget = 24 * 1024 * 1024                  # headroom under v7x 64 MiB
    per_row = 2 * 5 * (F + L) * itemsize            # 2x = double buffering
    weight_bytes = 2 * L * F * w_itemsize
    cap = max(8, ((vmem_budget - weight_bytes) // max(per_row, 1)) // 8 * 8)

    if B <= cap:
        tm = B      # single grid step: weight fetched once, no megacore split
    else:
        tm = cap    # multiple of 8; last block may be partial (masked stores)
    grid = (pl.cdiv(B, tm),)

    row_spec = pl.BlockSpec((tm, F), lambda i: (i, 0))
    out_spec = pl.BlockSpec((tm, L), lambda i: (i, 0))
    w_spec = pl.BlockSpec((L, F), lambda i: (0, 0))    # resident across steps

    out_sds = jax.ShapeDtypeStruct((B, L), out_dtype)
    kernel = functools.partial(_pmlabla1_kernel, mxu_dtype=mxu_dtype)

    return pl.pallas_call(
        kernel,
        out_shape=(out_sds,) * 5,
        grid=grid,
        in_specs=[row_spec] * 5 + [w_spec],
        out_specs=(out_spec,) * 5,
        compiler_params=pltpu.CompilerParams(
            dimension_semantics=("parallel",),
            vmem_limit_bytes=48 * 1024 * 1024),
    )(anchor, positive, negative, negative2, positive2, w_linear)


def _reference(anchor, positive, negative, negative2, positive2, w_linear):
    lin = lambda z: z @ w_linear.T
    return (lin(anchor), lin(positive), lin(negative),
            lin(negative2), lin(positive2))


if __name__ == "__main__":
    B, n_feature, n_linear = 8, 32, 128

    key = jax.random.PRNGKey(0)
    keys = jax.random.split(key, 6)

    anchor    = jax.random.normal(keys[0], (B, n_feature), jnp.float32)
    positive  = jax.random.normal(keys[1], (B, n_feature), jnp.float32)
    negative  = jax.random.normal(keys[2], (B, n_feature), jnp.float32)
    negative2 = jax.random.normal(keys[3], (B, n_feature), jnp.float32)
    positive2 = jax.random.normal(keys[4], (B, n_feature), jnp.float32)

    # torch Linear layout: weight is [out_features, in_features], no bias
    w_linear = jax.random.normal(keys[5], (n_linear, n_feature), jnp.float32) * 0.1

    outs = pmlabla1net_forward(anchor, positive, negative, negative2, positive2,
                               w_linear)
    outs = jax.block_until_ready(outs)

    refs = _reference(anchor, positive, negative, negative2, positive2, w_linear)
    for o, r in zip(outs, refs):
        assert o.shape == r.shape and o.dtype == r.dtype
        # bf16 MXU operands with f32 accumulation over K=32 -> loose-ish tol.
        max_err = float(jnp.max(jnp.abs(o - r)))
        assert jnp.allclose(o, r, atol=5e-2, rtol=5e-2), max_err

    print("KERNEL_OK")
</pallas_src>

<mosaic_0001>
module attributes {stable_mosaic.version = 11 : i64} {
  func.func @_pmlabla1_kernel(%arg0: i32, %arg1: memref<8x32xf32, #tpu.memory_space<vmem>>, %arg2: memref<8x32xf32, #tpu.memory_space<vmem>>, %arg3: memref<8x32xf32, #tpu.memory_space<vmem>>, %arg4: memref<8x32xf32, #tpu.memory_space<vmem>>, %arg5: memref<8x32xf32, #tpu.memory_space<vmem>>, %arg6: memref<128x32xf32, #tpu.memory_space<vmem>>, %arg7: memref<8x128xf32, #tpu.memory_space<vmem>>, %arg8: memref<8x128xf32, #tpu.memory_space<vmem>>, %arg9: memref<8x128xf32, #tpu.memory_space<vmem>>, %arg10: memref<8x128xf32, #tpu.memory_space<vmem>>, %arg11: memref<8x128xf32, #tpu.memory_space<vmem>>) attributes {dimension_semantics = [#tpu.dimension_semantics<parallel>], iteration_bounds = array<i64: 1>, scalar_prefetch = 0 : i64, scratch_operands = 0 : i64, tpu.core_type = #tpu.core_type<tc>, window_params = [{transform_indices = @transform_0, window_bounds = array<i64: 8, 32>}, {transform_indices = @transform_1, window_bounds = array<i64: 8, 32>}, {transform_indices = @transform_2, window_bounds = array<i64: 8, 32>}, {transform_indices = @transform_3, window_bounds = array<i64: 8, 32>}, {transform_indices = @transform_4, window_bounds = array<i64: 8, 32>}, {pipeline_mode = #tpu.pipeline_mode<synchronous>, transform_indices = @transform_5, window_bounds = array<i64: 128, 32>}, {transform_indices = @transform_6, window_bounds = array<i64: 8, 128>}, {transform_indices = @transform_7, window_bounds = array<i64: 8, 128>}, {transform_indices = @transform_8, window_bounds = array<i64: 8, 128>}, {transform_indices = @transform_9, window_bounds = array<i64: 8, 128>}, {transform_indices = @transform_10, window_bounds = array<i64: 8, 128>}]} {
    %c0 = arith.constant 0 : index
    %c0_0 = arith.constant 0 : index
    %0 = vector.load %arg6[%c0, %c0_0] : memref<128x32xf32, #tpu.memory_space<vmem>>, vector<128x32xf32>
    %1 = arith.truncf %0 : vector<128x32xf32> to vector<128x32xbf16>
    %c0_1 = arith.constant 0 : index
    %c0_2 = arith.constant 0 : index
    %2 = vector.load %arg1[%c0_1, %c0_2] : memref<8x32xf32, #tpu.memory_space<vmem>>, vector<8x32xf32>
    %3 = arith.truncf %2 : vector<8x32xf32> to vector<8x32xbf16>
    %cst = arith.constant dense<0.000000e+00> : vector<8x128xf32>
    %4 = tpu.matmul %3, %1, %cst {dimension_numbers = #tpu.dot_dimension_numbers<[1], [1], [0], [0], [0, 0, 1, 0], [], []>} : vector<8x32xbf16>, vector<128x32xbf16>, vector<8x128xf32> -> vector<8x128xf32>
    %c0_3 = arith.constant 0 : index
    %c0_4 = arith.constant 0 : index
    %5 = vector.load %arg7[%c0_3, %c0_4] : memref<8x128xf32, #tpu.memory_space<vmem>>, vector<8x128xf32>
    tpu.vector_store %arg7[%c0_3, %c0_4], %4 {strides = array<i32>} : memref<8x128xf32, #tpu.memory_space<vmem>>, vector<8x128xf32>,
    %c0_5 = arith.constant 0 : index
    %c0_6 = arith.constant 0 : index
    %6 = vector.load %arg2[%c0_5, %c0_6] : memref<8x32xf32, #tpu.memory_space<vmem>>, vector<8x32xf32>
    %7 = arith.truncf %6 : vector<8x32xf32> to vector<8x32xbf16>
    %cst_7 = arith.constant dense<0.000000e+00> : vector<8x128xf32>
    %8 = tpu.matmul %7, %1, %cst_7 {dimension_numbers = #tpu.dot_dimension_numbers<[1], [1], [0], [0], [0, 0, 1, 0], [], []>} : vector<8x32xbf16>, vector<128x32xbf16>, vector<8x128xf32> -> vector<8x128xf32>
    %c0_8 = arith.constant 0 : index
    %c0_9 = arith.constant 0 : index
    %9 = vector.load %arg8[%c0_8, %c0_9] : memref<8x128xf32, #tpu.memory_space<vmem>>, vector<8x128xf32>
    tpu.vector_store %arg8[%c0_8, %c0_9], %8 {strides = array<i32>} : memref<8x128xf32, #tpu.memory_space<vmem>>, vector<8x128xf32>,
    %c0_10 = arith.constant 0 : index
    %c0_11 = arith.constant 0 : index
    %10 = vector.load %arg3[%c0_10, %c0_11] : memref<8x32xf32, #tpu.memory_space<vmem>>, vector<8x32xf32>
    %11 = arith.truncf %10 : vector<8x32xf32> to vector<8x32xbf16>
    %cst_12 = arith.constant dense<0.000000e+00> : vector<8x128xf32>
    %12 = tpu.matmul %11, %1, %cst_12 {dimension_numbers = #tpu.dot_dimension_numbers<[1], [1], [0], [0], [0, 0, 1, 0], [], []>} : vector<8x32xbf16>, vector<128x32xbf16>, vector<8x128xf32> -> vector<8x128xf32>
    %c0_13 = arith.constant 0 : index
    %c0_14 = arith.constant 0 : index
    %13 = vector.load %arg9[%c0_13, %c0_14] : memref<8x128xf32, #tpu.memory_space<vmem>>, vector<8x128xf32>
    tpu.vector_store %arg9[%c0_13, %c0_14], %12 {strides = array<i32>} : memref<8x128xf32, #tpu.memory_space<vmem>>, vector<8x128xf32>,
    %c0_15 = arith.constant 0 : index
    %c0_16 = arith.constant 0 : index
    %14 = vector.load %arg4[%c0_15, %c0_16] : memref<8x32xf32, #tpu.memory_space<vmem>>, vector<8x32xf32>
    %15 = arith.truncf %14 : vector<8x32xf32> to vector<8x32xbf16>
    %cst_17 = arith.constant dense<0.000000e+00> : vector<8x128xf32>
    %16 = tpu.matmul %15, %1, %cst_17 {dimension_numbers = #tpu.dot_dimension_numbers<[1], [1], [0], [0], [0, 0, 1, 0], [], []>} : vector<8x32xbf16>, vector<128x32xbf16>, vector<8x128xf32> -> vector<8x128xf32>
    %c0_18 = arith.constant 0 : index
    %c0_19 = arith.constant 0 : index
    %17 = vector.load %arg10[%c0_18, %c0_19] : memref<8x128xf32, #tpu.memory_space<vmem>>, vector<8x128xf32>
    tpu.vector_store %arg10[%c0_18, %c0_19], %16 {strides = array<i32>} : memref<8x128xf32, #tpu.memory_space<vmem>>, vector<8x128xf32>,
    %c0_20 = arith.constant 0 : index
    %c0_21 = arith.constant 0 : index
    %18 = vector.load %arg5[%c0_20, %c0_21] : memref<8x32xf32, #tpu.memory_space<vmem>>, vector<8x32xf32>
    %19 = arith.truncf %18 : vector<8x32xf32> to vector<8x32xbf16>
    %cst_22 = arith.constant dense<0.000000e+00> : vector<8x128xf32>
    %20 = tpu.matmul %19, %1, %cst_22 {dimension_numbers = #tpu.dot_dimension_numbers<[1], [1], [0], [0], [0, 0, 1, 0], [], []>} : vector<8x32xbf16>, vector<128x32xbf16>, vector<8x128xf32> -> vector<8x128xf32>
    %c0_23 = arith.constant 0 : index
    %c0_24 = arith.constant 0 : index
    %21 = vector.load %arg11[%c0_23, %c0_24] : memref<8x128xf32, #tpu.memory_space<vmem>>, vector<8x128xf32>
    tpu.vector_store %arg11[%c0_23, %c0_24], %20 {strides = array<i32>} : memref<8x128xf32, #tpu.memory_space<vmem>>, vector<8x128xf32>,
    return
  }
  func.func @transform_0(%arg0: i32) -> (i32, i32) {
    %c0_i32 = arith.constant 0 : i32
    %c0_i32_0 = arith.constant 0 : i32
    return %arg0, %c0_i32 : i32, i32
  }
  func.func @transform_1(%arg0: i32) -> (i32, i32) {
    %c0_i32 = arith.constant 0 : i32
    %c0_i32_0 = arith.constant 0 : i32
    return %arg0, %c0_i32 : i32, i32
  }
  func.func @transform_2(%arg0: i32) -> (i32, i32) {
    %c0_i32 = arith.constant 0 : i32
    %c0_i32_0 = arith.constant 0 : i32
    return %arg0, %c0_i32 : i32, i32
  }
  func.func @transform_3(%arg0: i32) -> (i32, i32) {
    %c0_i32 = arith.constant 0 : i32
    %c0_i32_0 = arith.constant 0 : i32
    return %arg0, %c0_i32 : i32, i32
  }
  func.func @transform_4(%arg0: i32) -> (i32, i32) {
    %c0_i32 = arith.constant 0 : i32
    %c0_i32_0 = arith.constant 0 : i32
    return %arg0, %c0_i32 : i32, i32
  }
  func.func @transform_5(%arg0: i32) -> (i32, i32) {
    %c0_i32 = arith.constant 0 : i32
    %c0_i32_0 = arith.constant 0 : i32
    %c0_i32_1 = arith.constant 0 : i32
    return %c0_i32, %c0_i32_0 : i32, i32
  }
  func.func @transform_6(%arg0: i32) -> (i32, i32) {
    %c0_i32 = arith.constant 0 : i32
    %c0_i32_0 = arith.constant 0 : i32
    return %arg0, %c0_i32 : i32, i32
  }
  func.func @transform_7(%arg0: i32) -> (i32, i32) {
    %c0_i32 = arith.constant 0 : i32
    %c0_i32_0 = arith.constant 0 : i32
    return %arg0, %c0_i32 : i32, i32
  }
  func.func @transform_8(%arg0: i32) -> (i32, i32) {
    %c0_i32 = arith.constant 0 : i32
    %c0_i32_0 = arith.constant 0 : i32
    return %arg0, %c0_i32 : i32, i32
  }
  func.func @transform_9(%arg0: i32) -> (i32, i32) {
    %c0_i32 = arith.constant 0 : i32
    %c0_i32_0 = arith.constant 0 : i32
    return %arg0, %c0_i32 : i32, i32
  }
  func.func @transform_10(%arg0: i32) -> (i32, i32) {
    %c0_i32 = arith.constant 0 : i32
    %c0_i32_0 = arith.constant 0 : i32
    return %arg0, %c0_i32 : i32, i32
  }
}

</mosaic_0001>

<bundles_post_ra>
// kernel: tpu_custom_call.1
= control target key start
LH: loop header
LB: loop body
LE: loop exit
PB: predicated region body
PF: predicated region fallthrough
CT: control target
= control target key end

     0   :  { %16 = vsyncpa [#allocation3], 0  ;;  %s963_s0 = inlined_call_operand.vmem [shape: f32[8,32], index: 0, kind: input, shape index: {}]   ;;  %s964_s1 = inlined_call_operand.vmem [shape: f32[8,32], index: 1, kind: input, shape index: {}]   ;;  %s965_s2 = inlined_call_operand.vmem [shape: f32[8,32], index: 2, kind: input, shape index: {}]   ;;  %s966_s3 = inlined_call_operand.vmem [shape: f32[8,32], index: 3, kind: input, shape index: {}]   ;;  %s967_s4 = inlined_call_operand.vmem [shape: f32[8,32], index: 4, kind: input, shape index: {}]   ;;  %s968_s5 = inlined_call_operand.vmem [shape: f32[128,32], index: 5, kind: input, shape index: {}]   ;;  %s969_s6 = inlined_call_operand.hbm [shape: f32[8,128], index: 6, kind: output, shape index: {0}]   ;;  %s970_s7 = inlined_call_operand.hbm [shape: f32[8,128], index: 7, kind: output, shape index: {1}]   ;;  %s971_s8 = inlined_call_operand.hbm [shape: f32[8,128], index: 8, kind: output, shape index: {2}]   ;;  %s972_s9 = inlined_call_operand.hbm [shape: f32[8,128], index: 9, kind: output, shape index: {3}]   ;;  %s973_s10 = inlined_call_operand.hbm [shape: f32[8,128], index: 10, kind: output, shape index: {4}]  }
   0x1   :  { %17 = vsyncpa [#allocation5], 0  ;;  %v32_v0 = vld [vmem:[%s968_s5] sm:$0xff]  ;;  %v33_v1 = vld [vmem:[%s968_s5 + $0x8] sm:$0xff]  ;;  %vm58_vm0 = vcmask 261120   ;;  %v652_v2 = vmov 0.0  }
   0x2   :  { %429 = vmatprep.subr.bf16.mxu0 %v652_v2  ;;  %v48_v3 = vpack.c.bf16 %v33_v1, %v32_v0  ;;  %449 = vmatprep.subr.bf16.mxu1 %v652_v2  ;;  %v34_v4 = vld [vmem:[%s968_s5 + $0x10] sm:$0xff]  ;;  %v35_v5 = vld [vmem:[%s968_s5 + $0x18] sm:$0xff]  ;;  %vm653_vm1 = vmmov 0  }
   0x3   :  { %445 = vmatprep.mubr.msk.bf16.mxu0 %vm653_vm1, %v652_v2  ;;  %465 = vmatprep.mubr.msk.bf16.mxu1 %vm653_vm1, %v652_v2  ;;  %v49_v7 = vpack.c.bf16 %v35_v5, %v34_v4 }
   0x4   :  { %v733_v6 = vsel %vm58_vm0, %v48_v3, 0 }
   0x5   :  { %430 = vmatpush3.bf16.xpose.msra.mxu0 %v733_v6  ;;  %450 = vmatpush3.bf16.xpose.msra.mxu1 %v733_v6 }
   0x6   :  { %431 = vmatprep.subr.bf16.mxu0 %v652_v2  ;;  %451 = vmatprep.subr.bf16.mxu1 %v652_v2 }
   0x7   :  { %18 = vsyncpa [#allocation8], 0  ;;  %v740_v8 = vsel %vm58_vm0, %v49_v7, 0  ;;  %v36_v9 = vld [vmem:[%s968_s5 + $0x20] sm:$0xff]  ;;  %v37_v10 = vld [vmem:[%s968_s5 + $0x28] sm:$0xff]  ;;  %s654_s30 = smov [#allocation4]  }
   0x8   :  { %v50_v11 = vpack.c.bf16 %v37_v10, %v36_v9  ;;  %v38_v13 = vld [vmem:[%s968_s5 + $0x30] sm:$0xff]  ;;  %v39_v14 = vld [vmem:[%s968_s5 + $0x38] sm:$0xff]  ;;  %v40_v17 = vld [vmem:[%s968_s5 + $0x40] sm:$0xff]  ;;  %s327_s11 = sshll.u32 %s654_s30, 4  ;;  %s328_s11 = int_to_ptr.vmem [resolvable:$true] %s327_s11 }
   0x9   :  { %v51_v15 = vpack.c.bf16 %v39_v14, %v38_v13  ;;  %v41_v18 = vld [vmem:[%s968_s5 + $0x48] sm:$0xff]  ;;  %v42_v21 = vld [vmem:[%s968_s5 + $0x50] sm:$0xff]  ;;  %v43_v22 = vld [vmem:[%s968_s5 + $0x58] sm:$0xff]  ;;  %s536_s12 = scalar_lea.vmem %s328_s11, 128  ;;  %p541_p1 = scmp.lt.s32.totalorder %s328_s11, %s328_s11 }
   0xa   :  { %v753_v12 = vsel %vm58_vm0, %v50_v11, 0  ;;  %v52_v19 = vpack.c.bf16 %v41_v18, %v40_v17  ;;  %v53_v23 = vpack.c.bf16 %v43_v22, %v42_v21  ;;  %v44_v25 = vld [vmem:[%s968_s5 + $0x60] sm:$0xff]  ;;  %v45_v26 = vld [vmem:[%s968_s5 + $0x68] sm:$0xff]  ;;  %v46_v29 = vld [vmem:[%s968_s5 + $0x70] sm:$0xff]  ;;  %p537_p0 = scmp.ne.s32.totalorder %s328_s11, %s536_s12  ;;  %p542_p2 = scmp.lt.s32.totalorder %s536_s12, %s536_s12 }
   0xb   :  { %v766_v16 = vsel %vm58_vm0, %v51_v15, 0  ;;  %v54_v27 = vpack.c.bf16 %v45_v26, %v44_v25  ;;  %v47_v30 = vld [vmem:[%s968_s5 + $0x78] sm:$0xff]  ;;  %v56_v33 = vld [vmem:[%s963_s0] sm:$0xff] }
   0xc   :  { %v779_v20 = vsel %vm58_vm0, %v52_v19, 0  ;;  %v792_v24 = vsel %vm58_vm0, %v53_v23, 0  ;;  %v55_v31 = vpack.c.bf16 %v47_v30, %v46_v29  ;;  %v127_v34 = vld [vmem:[%s964_s1] sm:$0xff]  ;;  %v57_v35 = vpack.c.bf16 %v56_v33, %v56_v33  ;;  %p543_p3 = por %p542_p2, %p541_p1 }
   0xd   :  { %432 = vmatpush3.bf16.xpose.msra.mxu0 %v740_v8  ;;  %452 = vmatpush3.bf16.xpose.msra.mxu1 %v740_v8  ;;  %v805_v28 = vsel %vm58_vm0, %v54_v27, 0  ;;  %v128_v36 = vpack.c.bf16 %v127_v34, %v127_v34  ;;  %v173_v37 = vld [vmem:[%s965_s2] sm:$0xff] }
   0xe   :  { %433 = vmatprep.subr.bf16.mxu0 %v652_v2  ;;  %453 = vmatprep.subr.bf16.mxu1 %v652_v2  ;;  %v818_v32 = vsel %vm58_vm0, %v55_v31, 0  ;;  %v219_v38 = vld [vmem:[%s966_s3] sm:$0xff]  ;;  %v174_v39 = vpack.c.bf16 %v173_v37, %v173_v37  ;;  %p544_p4 = pnand %p543_p3, %p537_p0 }
   0xf   :  { %v220_v40 = vpack.c.bf16 %v219_v38, %v219_v38  ;;  %v265_v41 = vld [vmem:[%s967_s4] sm:$0xff] }
  0x10   :  { %v266_v42 = vpack.c.bf16 %v265_v41, %v265_v41 }
  0x15   :  { %434 = vmatpush3.bf16.xpose.msra.mxu0 %v753_v12  ;;  %454 = vmatpush3.bf16.xpose.msra.mxu1 %v753_v12 }
  0x16   :  { %435 = vmatprep.subr.bf16.mxu0 %v652_v2  ;;  %455 = vmatprep.subr.bf16.mxu1 %v652_v2 }
  0x1d   :  { %436 = vmatpush3.bf16.xpose.msra.mxu0 %v766_v16  ;;  %456 = vmatpush3.bf16.xpose.msra.mxu1 %v766_v16 }
  0x1e   :  { %437 = vmatprep.subr.bf16.mxu0 %v652_v2  ;;  %457 = vmatprep.subr.bf16.mxu1 %v652_v2 }
  0x25   :  { %438 = vmatpush3.bf16.xpose.msra.mxu0 %v779_v20  ;;  %458 = vmatpush3.bf16.xpose.msra.mxu1 %v779_v20 }
  0x26   :  { %439 = vmatprep.subr.bf16.mxu0 %v652_v2  ;;  %459 = vmatprep.subr.bf16.mxu1 %v652_v2 }
  0x2d   :  { %440 = vmatpush3.bf16.xpose.msra.mxu0 %v792_v24  ;;  %460 = vmatpush3.bf16.xpose.msra.mxu1 %v792_v24 }
  0x2e   :  { %441 = vmatprep.subr.bf16.mxu0 %v652_v2  ;;  %461 = vmatprep.subr.bf16.mxu1 %v652_v2 }
  0x35   :  { %442 = vmatpush3.bf16.xpose.msra.mxu0 %v805_v28  ;;  %462 = vmatpush3.bf16.xpose.msra.mxu1 %v805_v28 }
  0x36   :  { %443 = vmatprep.subr.bf16.mxu0 %v652_v2  ;;  %463 = vmatprep.subr.bf16.mxu1 %v652_v2 }
  0x3d   :  { %444 = vmatpush3.bf16.xpose.msra.mxu0 %v818_v32  ;;  %464 = vmatpush3.bf16.xpose.msra.mxu1 %v818_v32 }
  0x3e   :  { %469 = vmatprep.subr.bf16.mxu0 %v652_v2  ;;  %489 = vmatprep.subr.bf16.mxu1 %v652_v2 }
  0x44   :  { %446 = vmatmul.mubr.msk.bf16.vlgmr.msra.gmra.mrb[0].mxu0 %vm58_vm0, %v57_v35  ;;  %466 = vmatmul.mubr.msk.bf16.vlgmr.msra.gmra.mrb[0].mxu1 %vm58_vm0, %v128_v36 }
  0x45   :  { %470 = vmatpush3.bf16.xpose.msra.mxu0 %v733_v6  ;;  %490 = vmatpush3.bf16.xpose.msra.mxu1 %v733_v6 }
  0x46   :  { %471 = vmatprep.subr.bf16.mxu0 %v652_v2  ;;  %485 = vmatprep.mubr.msk.bf16.mxu0 %vm653_vm1, %v652_v2 }
  0x47   :  { %491 = vmatprep.subr.bf16.mxu1 %v652_v2  ;;  %505 = vmatprep.mubr.msk.bf16.mxu1 %vm653_vm1, %v652_v2 }
  0x4d   :  { %472 = vmatpush3.bf16.xpose.msra.mxu0 %v740_v8  ;;  %492 = vmatpush3.bf16.xpose.msra.mxu1 %v740_v8 }
  0x4e   :  { %473 = vmatprep.subr.bf16.mxu0 %v652_v2  ;;  %493 = vmatprep.subr.bf16.mxu1 %v652_v2 }
  0x55   :  { %474 = vmatpush3.bf16.xpose.msra.mxu0 %v753_v12  ;;  %494 = vmatpush3.bf16.xpose.msra.mxu1 %v753_v12 }
  0x56   :  { %475 = vmatprep.subr.bf16.mxu0 %v652_v2  ;;  %495 = vmatprep.subr.bf16.mxu1 %v652_v2 }
  0x5d   :  { %476 = vmatpush3.bf16.xpose.msra.mxu0 %v766_v16  ;;  %496 = vmatpush3.bf16.xpose.msra.mxu1 %v766_v16 }
  0x5e   :  { %477 = vmatprep.subr.bf16.mxu0 %v652_v2  ;;  %497 = vmatprep.subr.bf16.mxu1 %v652_v2 }
  0x65   :  { %478 = vmatpush3.bf16.xpose.msra.mxu0 %v779_v20  ;;  %498 = vmatpush3.bf16.xpose.msra.mxu1 %v779_v20 }
  0x66   :  { %479 = vmatprep.subr.bf16.mxu0 %v652_v2  ;;  %499 = vmatprep.subr.bf16.mxu1 %v652_v2 }
  0x6d   :  { %480 = vmatpush3.bf16.xpose.msra.mxu0 %v792_v24  ;;  %500 = vmatpush3.bf16.xpose.msra.mxu1 %v792_v24 }
  0x6e   :  { %481 = vmatprep.subr.bf16.mxu0 %v652_v2  ;;  %501 = vmatprep.subr.bf16.mxu1 %v652_v2 }
  0x75   :  { %482 = vmatpush3.bf16.xpose.msra.mxu0 %v805_v28  ;;  %502 = vmatpush3.bf16.xpose.msra.mxu1 %v805_v28 }
  0x76   :  { %483 = vmatprep.subr.bf16.mxu0 %v652_v2  ;;  %503 = vmatprep.subr.bf16.mxu1 %v652_v2 }
  0x7d   :  { %484 = vmatpush3.bf16.xpose.msra.mxu0 %v818_v32  ;;  %504 = vmatpush3.bf16.xpose.msra.mxu1 %v818_v32 }
  0x7e   :  { %509 = vmatprep.subr.bf16.mxu0 %v652_v2 }
  0x84   :  { %486 = vmatmul.mubr.msk.bf16.vlgmr.msra.gmra.mrb[4].mxu0 %vm58_vm0, %v174_v39  ;;  %506 = vmatmul.mubr.msk.bf16.vlgmr.msra.gmra.mrb[4].mxu1 %vm58_vm0, %v220_v40 }
  0x85   :  { %510 = vmatpush3.bf16.xpose.msra.mxu0 %v733_v6  ;;  %525 = vmatprep.mubr.msk.bf16.mxu0 %vm653_vm1, %v652_v2 }
  0x86   :  { %511 = vmatprep.subr.bf16.mxu0 %v652_v2 }
  0x8d   :  { %512 = vmatpush3.bf16.xpose.msra.mxu0 %v740_v8 }
  0x8e   :  { %513 = vmatprep.subr.bf16.mxu0 %v652_v2 }
  0x95   :  { %514 = vmatpush3.bf16.xpose.msra.mxu0 %v753_v12 }
  0x96   :  { %515 = vmatprep.subr.bf16.mxu0 %v652_v2 }
  0x9d   :  { %516 = vmatpush3.bf16.xpose.msra.mxu0 %v766_v16 }
  0x9e   :  { %517 = vmatprep.subr.bf16.mxu0 %v652_v2 }
  0xa5   :  { %518 = vmatpush3.bf16.xpose.msra.mxu0 %v779_v20 }
  0xa6   :  { %519 = vmatprep.subr.bf16.mxu0 %v652_v2 }
  0xad   :  { %520 = vmatpush3.bf16.xpose.msra.mxu0 %v792_v24 }
  0xae   :  { %521 = vmatprep.subr.bf16.mxu0 %v652_v2 }
  0xb5   :  { %522 = vmatpush3.bf16.xpose.msra.mxu0 %v805_v28 }
  0xb6   :  { %523 = vmatprep.subr.bf16.mxu0 %v652_v2 }
  0xbd   :  { %524 = vmatpush3.bf16.xpose.msra.mxu0 %v818_v32 }
  0xc4   :  { %526 = vmatmul.mubr.msk.bf16.vlgmr.msra.gmra.mrb[8].mxu0 %vm58_vm0, %v266_v42 }
 0x117   :  { %v120_v43 = vpop.f32.mrb[0].mxu0  ;;  %v166_v44 = vpop.f32.mrb[0].mxu1 }
 0x118   :  { %126 = vst [vmem:[#allocation2] sm:$0xff] %v120_v43  ;;  %v447_v45 = vpop.f32.mrb[1].mxu0  ;;  %172 = vst [vmem:[#allocation4] sm:$0xff] %v166_v44  ;;  %v467_v46 = vpop.f32.mrb[1].mxu1 }
 0x119   :  { %v123_v47 = vpop.f32.mrb[2].mxu0  ;;  %v169_v48 = vpop.f32.mrb[2].mxu1 }
 0x11a   :  { %547 = shalt.err (!%p544_p4)
}
 0x11b   :  { %s548_s14 = scalar_lea.hbm %s970_s7, 128 }
 0x11c   :  { %p549_p5 = scmp.ne.s32.totalorder %s970_s7, %s548_s14  ;;  %p552_p6 = scmp.lt.u32.totalorder %s548_s14, %s970_s7 }
 0x11e   :  { %p554_p7 = pnand %p552_p6, %p549_p5 }
 0x120   :  { %557 = shalt.err (!%p554_p7)
}
 0x121   :  { %330 = dma.vmem_to_hbm [thread:$0]  %s328_s11, 128, %s970_s7, [#allocation5]   ;;  %v448_v49 = vpop.f32.mrb[3].mxu0  ;;  %v468_v50 = vpop.f32.mrb[3].mxu1 }
 0x122   :  { %s655_s21 = smov [#allocation2]  }
 0x123   :  { %s317_s22 = sshll.u32 %s655_s21, 4  ;;  %s318_s22 = int_to_ptr.vmem [resolvable:$true] %s317_s22 }
 0x124   :  { %s558_s23 = scalar_lea.vmem %s318_s22, 128  ;;  %p563_p9 = scmp.lt.s32.totalorder %s318_s22, %s318_s22 }
 0x125   :  { %p559_p8 = scmp.ne.s32.totalorder %s318_s22, %s558_s23  ;;  %p564_p10 = scmp.lt.s32.totalorder %s558_s23, %s558_s23 }
 0x127   :  { %p565_p11 = por %p564_p10, %p563_p9 }
 0x129   :  { %p566_p12 = pnand %p565_p11, %p559_p8 }
 0x12b   :  { %569 = shalt.err (!%p566_p12)
}
 0x12c   :  { %s570_s26 = scalar_lea.hbm %s969_s6, 128 }
 0x12d   :  { %p571_p13 = scmp.ne.s32.totalorder %s969_s6, %s570_s26  ;;  %p574_p0 = scmp.lt.u32.totalorder %s570_s26, %s969_s6 }
 0x12f   :  { %p576_p1 = pnand %p574_p0, %p571_p13 }
 0x131   :  { %579 = shalt.err (!%p576_p1)
}
 0x132   :  { %320 = dma.vmem_to_hbm [thread:$0]  %s318_s22, 128, %s969_s6, [#allocation3]  }
 0x133   :  { %s656_s29 = smov [#allocation7]   ;;  %s657_s3 = smov [#allocation6]  }
 0x134   :  { %s347_s2 = sshll.u32 %s656_s29, 4  ;;  %s337_s30 = sshll.u32 %s657_s3, 4  ;;  %s348_s2 = int_to_ptr.vmem [resolvable:$true] %s347_s2  ;;  %s920_s30 = int_to_ptr.vmem [resolvable:$true] %s337_s30 }
 0x135   :  { %s580_s11 = scalar_lea.vmem %s348_s2, 128  ;;  %p585_p3 = scmp.lt.s32.totalorder %s348_s2, %s348_s2 }
 0x136   :  { %p581_p2 = scmp.ne.s32.totalorder %s348_s2, %s580_s11  ;;  %p586_p4 = scmp.lt.s32.totalorder %s580_s11, %s580_s11 }
 0x138   :  { %p587_p5 = por %p586_p4, %p585_p3 }
 0x13a   :  { %p588_p6 = pnand %p587_p5, %p581_p2 }
 0x157   :  { %v212_v51 = vpop.f32.mrb[4].mxu0  ;;  %v258_v52 = vpop.f32.mrb[4].mxu1 }
 0x158   :  { %218 = vst [vmem:[#allocation6] sm:$0xff] %v212_v51  ;;  %v487_v53 = vpop.f32.mrb[5].mxu0  ;;  %264 = vst [vmem:[#allocation7] sm:$0xff] %v258_v52  ;;  %v507_v54 = vpop.f32.mrb[5].mxu1 }
 0x159   :  { %v215_v55 = vpop.f32.mrb[6].mxu0  ;;  %v261_v56 = vpop.f32.mrb[6].mxu1 }
 0x15a   :  { %591 = shalt.err (!%p588_p6)
}
 0x15b   :  { %s592_s4 = scalar_lea.hbm %s972_s9, 128 }
 0x15c   :  { %p593_p7 = scmp.ne.s32.totalorder %s972_s9, %s592_s4  ;;  %p596_p8 = scmp.lt.u32.totalorder %s592_s4, %s972_s9 }
 0x15e   :  { %p598_p9 = pnand %p596_p8, %p593_p7 }
 0x160   :  { %601 = shalt.err (!%p598_p9)
}
 0x161   :  { %350 = dma.vmem_to_hbm [thread:$0]  %s348_s2, 128, %s972_s9, [#allocation8]   ;;  %v488_v57 = vpop.f32.mrb[7].mxu0  ;;  %v508_v58 = vpop.f32.mrb[7].mxu1 }
 0x162   :  { %s602_s19 = scalar_lea.vmem %s920_s30, 128  ;;  %p607_p11 = scmp.lt.s32.totalorder %s920_s30, %s920_s30 }
 0x163   :  { %p603_p10 = scmp.ne.s32.totalorder %s920_s30, %s602_s19  ;;  %p608_p12 = scmp.lt.s32.totalorder %s602_s19, %s602_s19 }
 0x165   :  { %p609_p13 = por %p608_p12, %p607_p11 }
 0x167   :  { %p610_p0 = pnand %p609_p13, %p603_p10 }
 0x169   :  { %613 = shalt.err (!%p610_p0)
}
 0x16a   :  { %s614_s22 = scalar_lea.hbm %s971_s8, 128 }
 0x16b   :  { %p615_p1 = scmp.ne.s32.totalorder %s971_s8, %s614_s22  ;;  %p618_p2 = scmp.lt.u32.totalorder %s614_s22, %s971_s8 }
 0x16d   :  { %p620_p3 = pnand %p618_p2, %p615_p1 }
 0x16f   :  { %623 = shalt.err (!%p620_p3)
}
 0x170   :  { %340 = dma.vmem_to_hbm [thread:$0]  %s920_s30, 128, %s971_s8, [#allocation5]  }
 0x171   :  { %s658_s27 = smov [#allocation9]  }
 0x172   :  { %s357_s7 = sshll.u32 %s658_s27, 4  ;;  %s358_s7 = int_to_ptr.vmem [resolvable:$true] %s357_s7 }
 0x173   :  { %s624_s0 = scalar_lea.vmem %s358_s7, 128  ;;  %p629_p5 = scmp.lt.s32.totalorder %s358_s7, %s358_s7 }
 0x174   :  { %p625_p4 = scmp.ne.s32.totalorder %s358_s7, %s624_s0  ;;  %p630_p6 = scmp.lt.s32.totalorder %s624_s0, %s624_s0 }
 0x176   :  { %p631_p7 = por %p630_p6, %p629_p5 }
 0x178   :  { %p632_p8 = pnand %p631_p7, %p625_p4 }
 0x197   :  { %v304_v59 = vpop.f32.mrb[8].mxu0 }
 0x198   :  { %310 = vst [vmem:[#allocation9] sm:$0xff] %v304_v59  ;;  %v527_v60 = vpop.f32.mrb[9].mxu0 }
 0x199   :  { %v307_v61 = vpop.f32.mrb[10].mxu0 }
 0x19a   :  { %635 = shalt.err (!%p632_p8)
}
 0x19b   :  { %s636_s29 = scalar_lea.hbm %s973_s10, 128 }
 0x19c   :  { %p637_p9 = scmp.ne.s32.totalorder %s973_s10, %s636_s29  ;;  %p640_p10 = scmp.lt.u32.totalorder %s636_s29, %s973_s10 }
 0x19e   :  { %p642_p11 = pnand %p640_p10, %p637_p9 }
 0x1a0   :  { %645 = shalt.err (!%p642_p11)
}
 0x1a1   :  { %360 = dma.vmem_to_hbm [thread:$0]  %s358_s7, 128, %s973_s10, [#allocation8]   ;;  %v528_v62 = vpop.f32.mrb[11].mxu0 }
 0x1a2   :  { %646 = dma.done.wait [#allocation3], 128  }
 0x1a3   :  { %647 = vsyncadd [#allocation3], 4294967168 }
 0x1a4   :  { %648 = dma.done.wait [#allocation5], 256  }
 0x1a5   :  { %649 = vsyncadd [#allocation5], 4294967040 }
 0x1a6   :  { %650 = dma.done.wait [#allocation8], 256  }
 0x1a7   :  { %651 = vsyncadd [#allocation8], 4294967040 }
 0x1a8   :  { %376 = vsyncpa [#allocation3], 1 }
 0x1a9   :  { %377 = vsyncpa [#allocation5], 1 }
 0x1aa   :  { %378 = vsyncpa [#allocation8], 1 }

</bundles_post_ra>
